<compile_context>
chip_gen: v7x
topology: tpu7x:2x2x1
jax: 0.10.0
libtpu: 0.0.40
codegen_flags: <defaults>
</compile_context>

<pallas_src>
import functools

import jax
import jax.numpy as jnp
from jax.experimental import pallas as pl
from jax.experimental.pallas import tpu as pltpu


def _round_up(x, m):
    return ((x + m - 1) // m) * m


def _domain_subset_accuracy_kernel(topk, num_classes, block_c,
                                   pred_ref, dom_ref, tgt_ref, tscore_ref,
                                   out_ref, rank_acc):
    j = pl.program_id(1)                      # class-tile index (reduction axis)
    nj = pl.num_programs(1)

    @pl.when(j == 0)
    def _():
        rank_acc[...] = jnp.zeros_like(rank_acc)

    pred = pred_ref[...].astype(jnp.float32)          # (TB, TC)
    dom = dom_ref[...].astype(jnp.float32)            # (1, TC) 0/1 indicator
    tgt = tgt_ref[...]                                # (TB, 1) int32
    tscore = tscore_ref[...]                          # (TB, 1) f32 boosted target score

    tb, tc = pred.shape
    # tile-local iota + scalar class offset (offset rides the scalar slots)
    cls_idx = jax.lax.broadcasted_iota(jnp.int32, (tb, tc), 1) + j * block_c

    # boost domain classes, exactly like prediction_[:, domain] += 100000.0
    boosted = pred + 100000.0 * dom                    # (TB, TC)

    # fused rank predicate: strictly-greater scores, plus equal scores at a
    # lower class index (torch.topk tie order), restricted to valid classes.
    beats = (boosted > tscore) | ((boosted == tscore) & (cls_idx < tgt))
    valid = cls_idx < num_classes
    rank_acc[...] += jnp.sum(jnp.where(beats & valid, 1.0, 0.0),
                             axis=1, keepdims=True)    # (TB, 1)

    @pl.when(j == nj - 1)
    def _():
        out_ref[...] = jnp.where(rank_acc[...] < float(topk), 1.0, 0.0)


def domain_subset_accuracy(prediction, target, domain, topk=1,
                           block_b=256, block_c=2048):
    """prediction: [B, C] float, target: [B] int, domain: list of class ids."""
    B, C = prediction.shape
    prediction = prediction.astype(jnp.float32)
    target = target.astype(jnp.int32)
    domain = jnp.asarray(domain, jnp.int32)

    # hoisted per-row gathers (done once in the wrapper, not inside the kernel)
    dom_vec = jnp.zeros((C,), jnp.float32).at[domain].set(1.0)
    mask_b = dom_vec[target]                                            # (B,)
    tgt_score = (jnp.take_along_axis(prediction, target[:, None], axis=1)[:, 0]
                 + 100000.0 * mask_b)                                   # (B,)

    # tile sizes: lane-dense class tiles (multiple of 128), 8-aligned batch tiles
    tb = block_b if B >= block_b else _round_up(B, 8)
    tc = block_c if C >= block_c else _round_up(C, 128)
    B_pad = _round_up(B, tb)
    C_pad = _round_up(C, tc)

    pred_p = jnp.zeros((B_pad, C_pad), jnp.float32).at[:B, :C].set(prediction)
    dom_p = jnp.zeros((1, C_pad), jnp.float32).at[0, :C].set(dom_vec)
    tgt_p = jnp.zeros((B_pad, 1), jnp.int32).at[:B, 0].set(target)
    tsc_p = jnp.zeros((B_pad, 1), jnp.float32).at[:B, 0].set(tgt_score)

    grid = (B_pad // tb, C_pad // tc)

    correct = pl.pallas_call(
        functools.partial(_domain_subset_accuracy_kernel, topk, C, tc),
        out_shape=jax.ShapeDtypeStruct((B_pad, 1), jnp.float32),
        grid_spec=pltpu.PrefetchScalarGridSpec(
            num_scalar_prefetch=0,
            grid=grid,
            in_specs=[
                pl.BlockSpec((tb, tc), lambda i, j: (i, j)),   # prediction
                pl.BlockSpec((1, tc), lambda i, j: (0, j)),    # domain indicator
                pl.BlockSpec((tb, 1), lambda i, j: (i, 0)),    # target ids
                pl.BlockSpec((tb, 1), lambda i, j: (i, 0)),    # boosted target score
            ],
            out_specs=pl.BlockSpec((tb, 1), lambda i, j: (i, 0)),
            scratch_shapes=[pltpu.VMEM((tb, 1), jnp.float32)],
        ),
        compiler_params=pltpu.CompilerParams(
            dimension_semantics=("parallel", "arbitrary"),
            vmem_limit_bytes=32 * 1024 * 1024,
        ),
    )(pred_p, dom_p, tgt_p, tsc_p)

    # mask applied outside the kernel on the tiny (B,) vectors; padded rows
    # are sliced away here.
    correct_k = jnp.sum(correct[:B, 0] * mask_b)
    batch_size = jnp.sum(mask_b)
    # TODO(synk): matches PyTorch's naive divide (inf/nan if no target in domain).
    return correct_k * (100.0 / batch_size)


def _reference(prediction, target, domain, topk=1):
    # pure-JAX reference mirroring the PyTorch forward (for sanity check)
    prediction = prediction.astype(jnp.float32)
    dom_vec = jnp.zeros((prediction.shape[1],), jnp.float32).at[
        jnp.asarray(domain)].set(1.0)
    mask = dom_vec[target] > 0
    boosted = prediction + 100000.0 * dom_vec[None, :]
    tgt_score = jnp.take_along_axis(boosted, target[:, None], axis=1)
    class_idx = jnp.arange(prediction.shape[1])[None, :]
    rank = jnp.sum((boosted > tgt_score)
                   | ((boosted == tgt_score) & (class_idx < target[:, None])),
                   axis=1)
    correct = (rank < topk) & mask
    return (100.0 * jnp.sum(correct.astype(jnp.float32))
            / jnp.sum(mask.astype(jnp.float32)))


if __name__ == "__main__":
    key = jax.random.PRNGKey(0)

    # --- small primary test: B=8, C=32, single tile --------------------------
    B, C = 8, 32
    domain = [1, 4, 7, 20]
    topk = 1
    kp, kt = jax.random.split(key)
    prediction = jax.random.normal(kp, (B, C), jnp.float32)
    target = jax.random.randint(kt, (B,), 0, C, jnp.int32)
    target = target.at[0].set(1).at[1].set(4).at[2].set(7)   # ensure mask non-empty

    acc = domain_subset_accuracy(prediction, target, domain, topk=topk)
    acc = jax.block_until_ready(acc)
    ref = _reference(prediction, target, domain, topk=topk)
    assert jnp.allclose(acc, ref, atol=1e-4), (acc, ref)

    # --- second test: padding + multi-tile grid (3x3) + topk=2 ---------------
    B2, C2 = 24, 300
    domain2 = [0, 5, 17, 123, 256, 299]
    kp2, kt2 = jax.random.split(kp)
    prediction2 = jax.random.normal(kp2, (B2, C2), jnp.float32)
    target2 = jax.random.randint(kt2, (B2,), 0, C2, jnp.int32)
    target2 = target2.at[0].set(5).at[1].set(123).at[2].set(299)

    acc2 = domain_subset_accuracy(prediction2, target2, domain2, topk=2,
                                  block_b=8, block_c=128)
    acc2 = jax.block_until_ready(acc2)
    ref2 = _reference(prediction2, target2, domain2, topk=2)
    assert jnp.allclose(acc2, ref2, atol=1e-4), (acc2, ref2)

    print("KERNEL_OK")
</pallas_src>

<mosaic_0001>
module attributes {stable_mosaic.version = 11 : i64} {
  func.func @_domain_subset_accuracy_kernel(%arg0: i32, %arg1: i32, %arg2: memref<8x128xf32, #tpu.memory_space<vmem>>, %arg3: memref<1x128xf32, #tpu.memory_space<vmem>>, %arg4: memref<8x1xi32, #tpu.memory_space<vmem>>, %arg5: memref<8x1xf32, #tpu.memory_space<vmem>>, %arg6: memref<8x1xf32, #tpu.memory_space<vmem>>, %arg7: memref<8x1xf32, #tpu.memory_space<vmem>>) attributes {dimension_semantics = [#tpu.dimension_semantics<parallel>, #tpu.dimension_semantics<arbitrary>], iteration_bounds = array<i64: 1, 1>, scalar_prefetch = 0 : i64, scratch_operands = 1 : i64, tpu.core_type = #tpu.core_type<tc>, window_params = [{transform_indices = @transform_0, window_bounds = array<i64: 8, 128>}, {transform_indices = @transform_1, window_bounds = array<i64: 1, 128>}, {transform_indices = @transform_2, window_bounds = array<i64: 8, 1>}, {transform_indices = @transform_3, window_bounds = array<i64: 8, 1>}, {transform_indices = @transform_4, window_bounds = array<i64: 8, 1>}]} {
    %c0_i32 = arith.constant 0 : i32
    %0 = arith.cmpi eq, %arg1, %c0_i32 : i32
    %1 = arith.extui %0 : i1 to i32
    %c0_i32_0 = arith.constant 0 : i32
    %2 = arith.cmpi ne, %1, %c0_i32_0 : i32
    scf.if %2 {
      %cst_17 = arith.constant 0.000000e+00 : f32
      %37 = vector.broadcast %cst_17 : f32 to vector<8x1xf32>
      %c0_18 = arith.constant 0 : index
      %c0_19 = arith.constant 0 : index
      %38 = vector.load %arg7[%c0_18, %c0_19] : memref<8x1xf32, #tpu.memory_space<vmem>>, vector<8x1xf32>
      tpu.vector_store %arg7[%c0_18, %c0_19], %37 {strides = array<i32>} : memref<8x1xf32, #tpu.memory_space<vmem>>, vector<8x1xf32>,
    } else {
    }
    %c0 = arith.constant 0 : index
    %c0_1 = arith.constant 0 : index
    %3 = vector.load %arg2[%c0, %c0_1] : memref<8x128xf32, #tpu.memory_space<vmem>>, vector<8x128xf32>
    %c0_2 = arith.constant 0 : index
    %c0_3 = arith.constant 0 : index
    %4 = vector.load %arg3[%c0_2, %c0_3] : memref<1x128xf32, #tpu.memory_space<vmem>>, vector<1x128xf32>
    %c0_4 = arith.constant 0 : index
    %c0_5 = arith.constant 0 : index
    %5 = vector.load %arg4[%c0_4, %c0_5] : memref<8x1xi32, #tpu.memory_space<vmem>>, vector<8x1xi32>
    %c0_6 = arith.constant 0 : index
    %c0_7 = arith.constant 0 : index
    %6 = vector.load %arg5[%c0_6, %c0_7] : memref<8x1xf32, #tpu.memory_space<vmem>>, vector<8x1xf32>
    %7 = tpu.iota {dimensions = array<i32: 1>} : vector<8x128xi32>
    %c128_i32 = arith.constant 128 : i32
    %8 = arith.muli %arg1, %c128_i32 : i32
    %9 = vector.broadcast %8 : i32 to vector<8x128xi32>
    %10 = arith.addi %7, %9 : vector<8x128xi32>
    %cst = arith.constant 1.000000e+05 : f32
    %11 = vector.broadcast %cst : f32 to vector<1x128xf32>
    %12 = arith.mulf %11, %4 : vector<1x128xf32>
    %13 = vector.broadcast %12 : vector<1x128xf32> to vector<8x128xf32>
    %14 = arith.addf %3, %13 : vector<8x128xf32>
    %15 = vector.broadcast %6 : vector<8x1xf32> to vector<8x128xf32>
    %16 = arith.cmpf ogt, %14, %15 : vector<8x128xf32>
    %17 = vector.broadcast %6 : vector<8x1xf32> to vector<8x128xf32>
    %18 = arith.cmpf oeq, %14, %17 : vector<8x128xf32>
    %19 = vector.broadcast %5 : vector<8x1xi32> to vector<8x128xi32>
    %20 = arith.cmpi slt, %10, %19 : vector<8x128xi32>
    %21 = arith.andi %18, %20 : vector<8x128xi1>
    %22 = arith.ori %16, %21 : vector<8x128xi1>
    %c32_i32 = arith.constant 32 : i32
    %23 = vector.broadcast %c32_i32 : i32 to vector<8x128xi32>
    %24 = arith.cmpi slt, %10, %23 : vector<8x128xi32>
    %c0_8 = arith.constant 0 : index
    %c0_9 = arith.constant 0 : index
    %25 = vector.load %arg7[%c0_8, %c0_9] : memref<8x1xf32, #tpu.memory_space<vmem>>, vector<8x1xf32>
    %26 = arith.andi %22, %24 : vector<8x128xi1>
    %cst_10 = arith.constant 1.000000e+00 : f32
    %cst_11 = arith.constant 0.000000e+00 : f32
    %27 = vector.broadcast %cst_10 : f32 to vector<8x128xf32>
    %28 = vector.broadcast %cst_11 : f32 to vector<8x128xf32>
    %29 = arith.select %26, %27, %28 : vector<8x128xi1>, vector<8x128xf32>
    %cst_12 = arith.constant dense<0.000000e+00> : vector<8xf32>
    %30 = vector.multi_reduction <add>, %29, %cst_12 [1] : vector<8x128xf32> to vector<8xf32>
    %31 = vector.shape_cast %30 : vector<8xf32> to vector<8x1xf32>
    %32 = arith.addf %25, %31 : vector<8x1xf32>
    %c0_13 = arith.constant 0 : index
    %c0_14 = arith.constant 0 : index
    %33 = vector.load %arg7[%c0_13, %c0_14] : memref<8x1xf32, #tpu.memory_space<vmem>>, vector<8x1xf32>
    tpu.vector_store %arg7[%c0_13, %c0_14], %32 {strides = array<i32>} : memref<8x1xf32, #tpu.memory_space<vmem>>, vector<8x1xf32>,
    %c0_i32_15 = arith.constant 0 : i32
    %34 = arith.cmpi eq, %arg1, %c0_i32_15 : i32
    %35 = arith.extui %34 : i1 to i32
    %c0_i32_16 = arith.constant 0 : i32
    %36 = arith.cmpi ne, %35, %c0_i32_16 : i32
    scf.if %36 {
      %c0_17 = arith.constant 0 : index
      %c0_18 = arith.constant 0 : index
      %37 = vector.load %arg7[%c0_17, %c0_18] : memref<8x1xf32, #tpu.memory_space<vmem>>, vector<8x1xf32>
      %cst_19 = arith.constant 1.000000e+00 : f32
      %38 = vector.broadcast %cst_19 : f32 to vector<8x1xf32>
      %39 = arith.cmpf olt, %37, %38 : vector<8x1xf32>
      %cst_20 = arith.constant 1.000000e+00 : f32
      %cst_21 = arith.constant 0.000000e+00 : f32
      %40 = vector.broadcast %cst_20 : f32 to vector<8x1xf32>
      %41 = vector.broadcast %cst_21 : f32 to vector<8x1xf32>
      %42 = arith.select %39, %40, %41 : vector<8x1xi1>, vector<8x1xf32>
      %c0_22 = arith.constant 0 : index
      %c0_23 = arith.constant 0 : index
      %43 = vector.load %arg6[%c0_22, %c0_23] : memref<8x1xf32, #tpu.memory_space<vmem>>, vector<8x1xf32>
      tpu.vector_store %arg6[%c0_22, %c0_23], %42 {strides = array<i32>} : memref<8x1xf32, #tpu.memory_space<vmem>>, vector<8x1xf32>,
    } else {
    }
    return
  }
  func.func @transform_0(%arg0: i32, %arg1: i32) -> (i32, i32) {
    %c0_i32 = arith.constant 0 : i32
    return %arg0, %arg1 : i32, i32
  }
  func.func @transform_1(%arg0: i32, %arg1: i32) -> (i32, i32) {
    %c0_i32 = arith.constant 0 : i32
    %c0_i32_0 = arith.constant 0 : i32
    return %c0_i32, %arg1 : i32, i32
  }
  func.func @transform_2(%arg0: i32, %arg1: i32) -> (i32, i32) {
    %c0_i32 = arith.constant 0 : i32
    %c0_i32_0 = arith.constant 0 : i32
    return %arg0, %c0_i32 : i32, i32
  }
  func.func @transform_3(%arg0: i32, %arg1: i32) -> (i32, i32) {
    %c0_i32 = arith.constant 0 : i32
    %c0_i32_0 = arith.constant 0 : i32
    return %arg0, %c0_i32 : i32, i32
  }
  func.func @transform_4(%arg0: i32, %arg1: i32) -> (i32, i32) {
    %c0_i32 = arith.constant 0 : i32
    %c0_i32_0 = arith.constant 0 : i32
    return %arg0, %c0_i32 : i32, i32
  }
}

</mosaic_0001>

<bundles_post_ra>
// kernel: tpu_custom_call.1
= control target key start
LH: loop header
LB: loop body
LE: loop exit
PB: predicated region body
PF: predicated region fallthrough
CT: control target
= control target key end

     0   :  { %v76_v0 = vmov 0   ;;  %vm21_vm0 = vcmask 7168   ;;  %v77_v3 = vmov 0.0   ;;  %v27_v4 = vlaneseq  ;;  %s121_s3 = inlined_call_operand.vmem [shape: f32[8,1], index: 3, kind: input, shape index: {}]   ;;  %s122_s2 = inlined_call_operand.vmem [shape: s32[8,1], index: 2, kind: input, shape index: {}]   ;;  %s123_s1 = inlined_call_operand.vmem [shape: f32[1,128], index: 1, kind: input, shape index: {}]   ;;  %s124_s0 = inlined_call_operand.vmem [shape: f32[8,128], index: 0, kind: input, shape index: {}]   ;;  %s125_s4 = inlined_call_operand.vmem [shape: f32[8,1], index: 4, kind: output, shape index: {}]  }
   0x1   :  { %75 = vset.pattern.permute.xlu0 %v76_v0  ;;  %v26_v1 = vld [vmem:[%s121_s3] sm:$0xff]  ;;  %22 = vst.msk [vmem:[#allocation2] sm:$0xff] %vm21_vm0, %v77_v3 }
   0x2   :  { %42 = vperm.xlu0 %75, %v26_v1   ;;  %v25_v2 = vld [vmem:[%s122_s2] sm:$0xff]  ;;  %v35_v5 = vshrl.u32 %v27_v4, 7  ;;  %v28_v13 = vand.u32 127, %v27_v4 }
   0x3   :  { %v24_v6 = vld [vmem:[%s123_s1] sm:$0x1] }
   0x4   :  { %v36_v7 = vsub.s32 0, %v35_v5  ;;  %v32_v8 = vmul.f32 100000.0, %v24_v6  ;;  %v23_v10 = vld [vmem:[%s124_s0] sm:$0xff]  ;;  %vm53_vm3 = vcmp.lt.s32.totalorder %v28_v13, 32 }
   0x6   :  { %48 = vperm.xlu0 %75, %v25_v2   ;;  %v37_v9 = vrot.slane %v32_v8, %v36_v7 }
   0x8   :  { %v39_v12 = vadd.f32 %v37_v9, %v23_v10  ;;  %v54_v16 = vld [vmem:[#allocation2] sm:$0xff] }
  0x81   :  { %v43_v11 = vpop.permute.xlu0 %42 }
  0x82   :  { %vm46_vm1 = vcmp.eq.f32.partialorder %v39_v12, %v43_v11  ;;  %vm45_vm4 = vcmp.gt.f32.partialorder %v39_v12, %v43_v11 }
  0x85   :  { %v49_v14 = vpop.permute.xlu0 %48 }
  0x86   :  { %vm50_vm2 = vcmp.lt.s32.totalorder %v28_v13, %v49_v14 }
  0x87   :  { %vm51_vm5 = vmand %vm46_vm1, %vm50_vm2 }
  0x88   :  { %vm52_vm6 = vmor %vm45_vm4, %vm51_vm5 }
  0x89   :  { %vm55_vm7 = vmand %vm52_vm6, %vm53_vm3 }
  0x8a   :  { %v56_v15 = vsel %vm55_vm7, 1.0, %v77_v3 }
  0x8b   :  { %57 = vadd.xlane.f32.xlu1 %v56_v15 }
 0x118   :  { %v58_v17 = vpop.xlane.xlu1 %57 }
 0x119   :  { %v59_v18 = vadd.f32 %v58_v17, %v54_v16 }
 0x11b   :  { %61 = vst.msk [vmem:[#allocation2] sm:$0xff] %vm21_vm0, %v59_v18 }
 0x122   :  { %v65_v19 = vld [vmem:[#allocation2] sm:$0xff] }
 0x123   :  { %vm66_vm8 = vcmp.lt.f32.partialorder %v65_v19, 1.0 }
 0x124   :  { %v67_v20 = vsel %vm66_vm8, 1.0, %v77_v3 }
 0x125   :  { %68 = vst.msk [vmem:[%s125_s4] sm:$0xff] %vm21_vm0, %v67_v20 }

</bundles_post_ra>
